<compile_context>
chip_gen: v7x
topology: tpu7x:2x2x1
jax: 0.10.0
libtpu: 0.0.40
codegen_flags: <defaults>
</compile_context>

<pallas_src>
import functools

import jax
import jax.numpy as jnp
from jax.experimental import pallas as pl
from jax.experimental.pallas import tpu as pltpu


def _char_quant_kernel(x_ref, o_ref, *, unk_idx: int):
    """One (row_block, seq_block) token tile per grid step.

    x_ref: VMEM (TB, TS) int32         token ids
    o_ref: VMEM (TB, TS, C) out_dtype  one-hot output tile
    """
    x = x_ref[...]                                        # (TB, TS)
    tb, ts = x.shape
    c = o_ref.shape[-1]

    # Global batch-row index of every token in this block.
    row0 = pl.program_id(0) * tb
    row_ids = row0 + jax.lax.broadcasted_iota(jnp.int32, (tb, ts), 0)

    # Literal `y[unk_idx] = 0`: remap tokens of that batch row to -1 so the
    # one-hot comparison below yields all zeros for it (cheap (TB, TS) select
    # instead of a full (TB, TS, C) tile select).
    x_adj = jnp.where(row_ids == unk_idx, jnp.int32(-1), x)

    cls_ids = jax.lax.broadcasted_iota(jnp.int32, (tb, ts, c), 2)
    o_ref[...] = (x_adj[:, :, None] == cls_ids).astype(o_ref.dtype)


def _pick_blocks(batch, seq, char_size, itemsize, target_bytes=2 << 20):
    """Pick (row_block, seq_block) giving ~target_bytes output tiles.

    Honors the (8, 128) rule on the last two dims of every block: the token
    block's sublane dim is a multiple of 8 (or == B) and its lane dim is a
    multiple of 128 (or == S); the output block's trailing dims are (TS, C)
    with C always the full extent.
    """
    row_bytes = seq * char_size * itemsize
    if row_bytes < target_bytes:
        # Whole sequence per row; stack batch rows up to the target.
        tb = target_bytes // row_bytes
        if tb >= batch:
            return batch, seq
        tb = max(8, (tb // 8) * 8)
        return min(tb, batch), seq
    # A single row already exceeds the target: take a few rows, tile the seq.
    tb = batch if batch <= 8 else 8
    per_row = max(target_bytes // tb, 128 * char_size * itemsize)
    ts = per_row // (char_size * itemsize)
    if ts >= seq:
        return tb, seq
    return tb, (ts // 128) * 128


def char_quantization(x: jax.Array, char_size: int, unk_idx: int,
                      out_dtype=jnp.int8,
                      row_block: int | None = None,
                      seq_block: int | None = None) -> jax.Array:
    """x: (B, S) integer token ids -> (B, S, char_size) one-hot in out_dtype."""
    if x.dtype != jnp.int32:
        x = x.astype(jnp.int32)
    B, S = x.shape
    itemsize = jnp.dtype(out_dtype).itemsize
    tb_auto, ts_auto = _pick_blocks(B, S, char_size, itemsize)
    tb = row_block if row_block is not None else tb_auto
    ts = seq_block if seq_block is not None else ts_auto
    grid = (pl.cdiv(B, tb), pl.cdiv(S, ts))

    kernel = functools.partial(_char_quant_kernel, unk_idx=int(unk_idx))
    out_bytes = B * S * char_size * itemsize
    return pl.pallas_call(
        kernel,
        out_shape=jax.ShapeDtypeStruct((B, S, char_size), out_dtype),
        grid=grid,
        in_specs=[pl.BlockSpec((tb, ts), lambda b, s: (b, s))],
        out_specs=pl.BlockSpec((tb, ts, char_size), lambda b, s: (b, s, 0)),
        compiler_params=pltpu.CompilerParams(
            dimension_semantics=("parallel", "parallel"),
        ),
        cost_estimate=pl.CostEstimate(
            flops=B * S * char_size,          # one compare per output element
            transcendentals=0,
            bytes_accessed=x.size * 4 + out_bytes,
        ),
    )(x)


def _reference(x, char_size, unk_idx, out_dtype=jnp.int8):
    y = jax.nn.one_hot(x, char_size, dtype=out_dtype)
    return y.at[unk_idx].set(0)


if __name__ == "__main__":
    CHAR_SIZE = 70          # typical char-CNN alphabet size
    key = jax.random.PRNGKey(0)

    # Test 1: small shapes consistent with the module's forward.
    B, S, UNK_IDX = 2, 16, 0
    x = jax.random.randint(key, (B, S), 0, CHAR_SIZE, dtype=jnp.int32)
    out = jax.block_until_ready(char_quantization(x, CHAR_SIZE, UNK_IDX))
    ref = _reference(x, CHAR_SIZE, UNK_IDX)
    assert out.shape == (B, S, CHAR_SIZE), out.shape
    assert out.dtype == jnp.int8, out.dtype
    assert (out == ref).all(), "mismatch vs. pure-JAX reference (test 1)"

    # Test 2: multi-block batch grid (explicit row_block) to exercise blocked
    # batch tiling and the per-row unk masking across grid steps.
    B2, S2, UNK2 = 32, 128, 3
    x2 = jax.random.randint(jax.random.PRNGKey(1), (B2, S2), 0, CHAR_SIZE, dtype=jnp.int32)
    out2 = jax.block_until_ready(char_quantization(x2, CHAR_SIZE, UNK2, row_block=8))
    ref2 = _reference(x2, CHAR_SIZE, UNK2)
    assert (out2 == ref2).all(), "mismatch vs. pure-JAX reference (test 2)"

    # Test 3: 2-D grid with partial blocks on both axes (batch 12 w/ tb=8,
    # seq 200 w/ ts=128) and unk row living in the second batch block.
    B3, S3, UNK3 = 12, 200, 10
    x3 = jax.random.randint(jax.random.PRNGKey(2), (B3, S3), 0, CHAR_SIZE, dtype=jnp.int32)
    out3 = jax.block_until_ready(
        char_quantization(x3, CHAR_SIZE, UNK3, row_block=8, seq_block=128))
    ref3 = _reference(x3, CHAR_SIZE, UNK3)
    assert (out3 == ref3).all(), "mismatch vs. pure-JAX reference (test 3)"

    print("KERNEL_OK")
</pallas_src>

<mosaic_0001>
module attributes {stable_mosaic.version = 11 : i64} {
  func.func @_char_quant_kernel(%arg0: i32, %arg1: i32, %arg2: memref<2x16xi32, #tpu.memory_space<vmem>>, %arg3: memref<2x16x70xi8, #tpu.memory_space<vmem>>) attributes {dimension_semantics = [#tpu.dimension_semantics<parallel>, #tpu.dimension_semantics<parallel>], iteration_bounds = array<i64: 1, 1>, scalar_prefetch = 0 : i64, scratch_operands = 0 : i64, tpu.core_type = #tpu.core_type<tc>, window_params = [{transform_indices = @transform_0, window_bounds = array<i64: 2, 16>}, {transform_indices = @transform_1, window_bounds = array<i64: 2, 16, 70>}]} {
    %c0 = arith.constant 0 : index
    %c0_0 = arith.constant 0 : index
    %0 = vector.load %arg2[%c0, %c0_0] : memref<2x16xi32, #tpu.memory_space<vmem>>, vector<2x16xi32>
    %c2_i32 = arith.constant 2 : i32
    %1 = arith.muli %arg0, %c2_i32 : i32
    %2 = tpu.iota {dimensions = array<i32: 0>} : vector<2x16xi32>
    %3 = vector.broadcast %1 : i32 to vector<2x16xi32>
    %4 = arith.addi %3, %2 : vector<2x16xi32>
    %c0_i32 = arith.constant 0 : i32
    %5 = vector.broadcast %c0_i32 : i32 to vector<2x16xi32>
    %6 = arith.cmpi eq, %4, %5 : vector<2x16xi32>
    %c-1_i32 = arith.constant -1 : i32
    %7 = vector.broadcast %c-1_i32 : i32 to vector<2x16xi32>
    %8 = arith.select %6, %7, %0 : vector<2x16xi1>, vector<2x16xi32>
    %9 = tpu.iota {dimensions = array<i32: 2>} : vector<2x16x70xi32>
    %10 = vector.shape_cast %8 : vector<2x16xi32> to vector<2x16x1xi32>
    %11 = vector.broadcast %10 : vector<2x16x1xi32> to vector<2x16x70xi32>
    %12 = arith.cmpi eq, %11, %9 : vector<2x16x70xi32>
    %13 = arith.extui %12 : vector<2x16x70xi1> to vector<2x16x70xi8>
    %c0_1 = arith.constant 0 : index
    %c0_2 = arith.constant 0 : index
    %c0_3 = arith.constant 0 : index
    %14 = vector.load %arg3[%c0_1, %c0_2, %c0_3] : memref<2x16x70xi8, #tpu.memory_space<vmem>>, vector<2x16x70xi8>
    tpu.vector_store %arg3[%c0_1, %c0_2, %c0_3], %13 {strides = array<i32>} : memref<2x16x70xi8, #tpu.memory_space<vmem>>, vector<2x16x70xi8>,
    return
  }
  func.func @transform_0(%arg0: i32, %arg1: i32) -> (i32, i32) {
    %c0_i32 = arith.constant 0 : i32
    return %arg0, %arg1 : i32, i32
  }
  func.func @transform_1(%arg0: i32, %arg1: i32) -> (i32, i32, i32) {
    %c0_i32 = arith.constant 0 : i32
    %c0_i32_0 = arith.constant 0 : i32
    return %arg0, %arg1, %c0_i32 : i32, i32, i32
  }
}

</mosaic_0001>

<bundles_post_ra>
// kernel: tpu_custom_call.1
= control target key start
LH: loop header
LB: loop body
LE: loop exit
PB: predicated region body
PF: predicated region fallthrough
CT: control target
= control target key end

     0   :  { %6 = vsyncpa [#allocation3], 0  ;;  %s191_s0 = inlined_call_operand.hbm [shape: s32[2,16], index: 0, kind: input, shape index: {}]   ;;  %s192_s1 = inlined_call_operand.hbm [shape: s8[2,16,70], index: 1, kind: output, shape index: {}]  }
   0x1   :  { %7 = vsyncpa [#allocation4], 0  ;;  %s152_s6 = smov [#allocation2]   ;;  %s104_s10 = scalar_lea.hbm %s191_s0, 32 }
   0x2   :  { %s14_s7 = sshll.u32 %s152_s6, 4  ;;  %p105_p0 = scmp.ne.s32.totalorder %s191_s0, %s104_s10  ;;  %s15_s7 = int_to_ptr.vmem [resolvable:$true] %s14_s7 }
   0x3   :  { %p108_p1 = scmp.lt.u32.totalorder %s104_s10, %s191_s0 }
   0x5   :  { %p110_p2 = pnand %p108_p1, %p105_p0 }
   0x7   :  { %113 = shalt.err (!%p110_p2)
}
   0x8   :  { %s114_s15 = scalar_lea.vmem %s15_s7, 32  ;;  %p119_p4 = scmp.lt.s32.totalorder %s15_s7, %s15_s7 }
   0x9   :  { %p115_p3 = scmp.ne.s32.totalorder %s15_s7, %s114_s15  ;;  %p120_p5 = scmp.lt.s32.totalorder %s114_s15, %s114_s15 }
   0xb   :  { %p121_p6 = por %p120_p5, %p119_p4 }
   0xd   :  { %p122_p7 = pnand %p121_p6, %p115_p3 }
   0xf   :  { %125 = shalt.err (!%p122_p7)
}
  0x10   :  { %17 = dma.hbm_to_vmem [thread:$0]  %s191_s0, 32, %s15_s7, [#allocation3]  }
  0x11   :  { %148 = dma.done.wait [#allocation3], 32  }
  0x12   :  { %149 = vsyncadd [#allocation3], 4294967264  ;;  %v25_v0 = vlaneseq  ;;  %v23_v4 = vld [vmem:[#allocation2] sm:$0x3]  ;;  %v153_v13 = vmov 0   ;;  %s154_s0 = smov [#allocation5]  }
  0x13   :  { %s87_s18 = sshll.u32 %s154_s0, 4  ;;  %vm77_vm9 = vcmask 566272   ;;  %s88_s18 = int_to_ptr.vmem [resolvable:$true] %s87_s18 }
  0x14   :  { %v26_v1 = vshrl.u32 %v25_v0, 7  ;;  %v32_v10 = vand.u32 127, %v25_v0  ;;  %s126_s19 = scalar_lea.vmem %s88_s18, 128  ;;  %p131_p9 = scmp.lt.s32.totalorder %s88_s18, %s88_s18 }
  0x15   :  { %p127_p8 = scmp.ne.s32.totalorder %s88_s18, %s126_s19  ;;  %p132_p10 = scmp.lt.s32.totalorder %s126_s19, %s126_s19 }
  0x16   :  { %vm29_vm0 = vcmp.eq.s32.totalorder %v26_v1, 0  ;;  %v46_v2 = vsub.s32 1, %v26_v1  ;;  %v35_v3 = vsub.s32 0, %v26_v1 }
  0x17   :  { %v30_v5 = vsel %vm29_vm0, 4294967295, %v23_v4  ;;  %p133_p11 = por %p132_p10, %p131_p9 }
  0x18   :  { %v47_v6 = vrot.slane %v30_v5, %v46_v2  ;;  %v36_v7 = vrot.slane %v30_v5, %v35_v3 }
  0x19   :  { %p134_p12 = pnand %p133_p11, %p127_p8 }
  0x1a   :  { %49 = vbcast.lane.b32.xlu1 %v47_v6, 256  ;;  %38 = vbcast.lane.b32.xlu0 %v36_v7, 256 }
  0x1e   :  { %53 = vbcast.lane.b32.xlu1 %v47_v6, 264  ;;  %42 = vbcast.lane.b32.xlu0 %v36_v7, 264 }
  0x8c   :  { %v50_v8 = vpop.permute.xlu1 %49  ;;  %v39_v9 = vpop.permute.xlu0 %38 }
  0x8d   :  { %vm57_vm1 = vcmp.eq.s32.totalorder %v50_v8, %v32_v10  ;;  %vm55_vm5 = vcmp.eq.s32.totalorder %v39_v9, %v32_v10 }
  0x90   :  { %v54_v11 = vpop.permute.xlu1 %53  ;;  %v43_v12 = vpop.permute.xlu0 %42 }
  0x91   :  { %vm58_vm2 = vcmp.eq.s32.totalorder %v54_v11, %v32_v10  ;;  %vm56_vm3 = vcmp.eq.s32.totalorder %v43_v12, %v32_v10 }
  0x92   :  { %vm61_vm4 = vmpackc.low %vm58_vm2, %vm57_vm1 }
  0x93   :  { %vm62_vm6 = vmpackc.even %vm61_vm4, %vm61_vm4 }
  0x94   :  { %v64_v14 = vsel %vm62_vm6, 16843009, %v153_v13  ;;  %vm59_vm7 = vmpackc.low %vm56_vm3, %vm55_vm5 }
  0x95   :  { %v67_v15 = vunpack.c.0.s8 %v64_v14  ;;  %v68_v16 = vunpack.c.1.s8 %v64_v14  ;;  %vm60_vm8 = vmpackc.even %vm59_vm7, %vm59_vm7 }
  0x96   :  { %v63_v17 = vsel %vm60_vm8, 16843009, %v153_v13 }
  0x97   :  { %v73_v18 = vpack.c.b16 %v67_v15, %v67_v15  ;;  %v75_v19 = vpack.c.b16 %v68_v16, %v68_v16  ;;  %v65_v20 = vunpack.c.0.s8 %v63_v17  ;;  %v66_v21 = vunpack.c.1.s8 %v63_v17 }
  0x99   :  { %v74_v22 = vpack.c.b8 %v73_v18, %v73_v18  ;;  %v76_v23 = vpack.c.b8 %v75_v19, %v75_v19  ;;  %v69_v24 = vpack.c.b16 %v65_v20, %v65_v20  ;;  %v71_v25 = vpack.c.b16 %v66_v21, %v66_v21 }
  0x9b   :  { %80 = vst.msk [vmem:[#allocation5 + $0x4] sm:$0x3] %vm77_vm9, %v74_v22  ;;  %81 = vst.msk [vmem:[#allocation5 + $0x6] sm:$0x3] %vm77_vm9, %v76_v23  ;;  %v70_v26 = vpack.c.b8 %v69_v24, %v69_v24  ;;  %v72_v27 = vpack.c.b8 %v71_v25, %v71_v25 }
  0x9d   :  { %78 = vst.msk [vmem:[#allocation5] sm:$0x3] %vm77_vm9, %v70_v26  ;;  %79 = vst.msk [vmem:[#allocation5 + $0x2] sm:$0x3] %vm77_vm9, %v72_v27 }
  0x9e   :  { %137 = shalt.err (!%p134_p12)
}
  0x9f   :  { %s138_s22 = scalar_lea.hbm %s192_s1, 128 }
  0xa0   :  { %p139_p13 = scmp.ne.s32.totalorder %s192_s1, %s138_s22  ;;  %p142_p0 = scmp.lt.u32.totalorder %s138_s22, %s192_s1 }
  0xa2   :  { %p144_p1 = pnand %p142_p0, %p139_p13 }
  0xa4   :  { %147 = shalt.err (!%p144_p1)
}
  0xa5   :  { %s155_s27 = smov 32   ;;  %s156_s28 = smov 2  }
  0xa6   :  { %93 = dma.vmem_to_hbm [thread:$0]  %s88_s18, 128, %s192_s1, [#allocation4], %s155_s27, %s155_s27, %s156_s28  }
  0xa7   :  { %150 = dma.done.wait [#allocation4], 128  }
  0xa8   :  { %151 = vsyncadd [#allocation4], 4294967168 }
  0xa9   :  { %97 = vsyncpa [#allocation3], 1 }
  0xaa   :  { %98 = vsyncpa [#allocation4], 1 }

</bundles_post_ra>
